<compile_context>
chip_gen: v5e
topology: v5e:2x2
jax: 0.10.0
libtpu: 0.0.40
codegen_flags: <defaults>
</compile_context>

<pallas_src>
import functools
import math

import jax
import jax.numpy as jnp
from jax.experimental import pallas as pl
from jax.experimental.pallas import tpu as pltpu


def _round_up(x, m):
    return (x + m - 1) // m * m


def _timestep_embedder_kernel(t_ref, freqs_ref, w1_ref, b1_ref, w2_ref, b2_ref,
                              out_ref, h_ref, *, bf16_silu):
    """One (row-tile, layer-2-column-tile) grid step.

    Layer 1 (sinusoidal embedding -> Linear -> SiLU) is computed once per row
    tile (at column step j == 0) into the persistent VMEM scratch `h_ref`
    (bf16); layer 2 consumes it for every output-column tile.
    """
    j = pl.program_id(1)

    @pl.when(j == 0)
    def _():
        t = t_ref[...]                                    # (TM, 1) f32
        args = t * freqs_ref[...]                         # (TM, half) f32
        # Single K = 2*half contraction (fills the 256-deep MXU on v6e/v7x).
        emb = jnp.concatenate([jnp.cos(args), jnp.sin(args)], axis=-1)
        h = jnp.dot(emb.astype(jnp.bfloat16), w1_ref[...],
                    preferred_element_type=jnp.float32) + b1_ref[...]
        if bf16_silu:                       # v6e/v7x: bf16 VPU/EUP paths
            hb = h.astype(jnp.bfloat16)
            h_ref[...] = hb * jax.nn.sigmoid(hb)
        else:                               # v5e: no bf16 VPU/EUP -> stay f32
            h_ref[...] = (h * jax.nn.sigmoid(h)).astype(jnp.bfloat16)

    out = jnp.dot(h_ref[...], w2_ref[...],
                  preferred_element_type=jnp.float32) + b2_ref[...]
    out_ref[...] = out.astype(out_ref.dtype)


def _default_bf16_silu():
    """bf16 SiLU only where the VPU/EUP have bf16 paths (v6e / v7x)."""
    try:
        kind = jax.devices()[0].device_kind.lower()
    except Exception:
        return False
    return ("v6" in kind) or ("v7" in kind)


def timestep_embedder(t, w1, b1, w2, b2, *, frequency_embedding_size=256,
                      max_period=10000, out_dtype=jnp.float32, bf16_silu=None):
    """TimestepEmbedder forward as one fused Pallas TPU kernel.

    t : (N,) f32 timesteps.
    w1: (frequency_embedding_size, hidden), b1: (1, hidden),
    w2: (hidden, hidden),                    b2: (1, hidden)
    (i.e. the nn.Linear weights stored transposed, (in, out)).
    Returns (N, hidden) in `out_dtype`.
    """
    if bf16_silu is None:
        bf16_silu = _default_bf16_silu()

    n = t.shape[0]
    hidden = w2.shape[1]
    half = frequency_embedding_size // 2

    # ---- tiling -------------------------------------------------------------
    hidden_pad = _round_up(hidden, 128)       # lane-dense layer-1 width / layer-2 K

    # Row tile: one step for tiny batches; >=2 steps for mid/large batches so
    # the "parallel" row axis feeds both v7x TensorCores; 16-row granularity
    # (bf16 sublane pair) for the bf16 activation scratch.
    rows = _round_up(max(n, 1), 16)
    if rows <= 256:
        tm = rows
    else:
        tm = min(512, _round_up(pl.cdiv(rows, 2), 16))
    n_pad = _round_up(rows, tm)

    # Layer-2 column tile: full width unless double-buffered w2 column slabs
    # would stress VMEM (v7x has 64 MiB / TensorCore).
    tn = hidden_pad
    while tn > 256 and hidden_pad * tn * 2 * 2 > (32 << 20):
        tn = _round_up(tn // 2, 128)
    hp_out = _round_up(hidden_pad, tn)        # padded layer-2 output columns
    n_col = hp_out // tn

    # ---- operands (padded, lane-dense, bf16 weights) -------------------------
    t2d = jnp.pad(t.astype(jnp.float32), (0, n_pad - n)).reshape(n_pad, 1)

    freqs = jnp.exp(-math.log(float(max_period)) *
                    jnp.arange(half, dtype=jnp.float32) / half).reshape(1, half)

    def _pad2(a, r, c):
        return jnp.pad(a, ((0, r - a.shape[0]), (0, c - a.shape[1])))

    # If frequency_embedding_size is odd the PyTorch module appends a zero
    # column; its weight row contributes nothing, so dropping w1[2*half:] is exact.
    w1p = _pad2(w1[:2 * half], 2 * half, hidden_pad).astype(jnp.bfloat16)
    b1p = _pad2(b1, 1, hidden_pad).astype(jnp.float32)
    w2p = _pad2(w2, hidden_pad, hp_out).astype(jnp.bfloat16)
    b2p = _pad2(b2, 1, hp_out).astype(jnp.float32)

    # ---- block specs ----------------------------------------------------------
    single = pl.Buffered(1)                    # grid-invariant: one VMEM buffer
    w2_mode = single if n_col == 1 else None   # column-varying -> default 2 buffers

    in_specs = [
        pl.BlockSpec((tm, 1), lambda i, j: (i, 0)),                           # t rows
        pl.BlockSpec((1, half), lambda i, j: (0, 0), pipeline_mode=single),   # freqs
        pl.BlockSpec((2 * half, hidden_pad), lambda i, j: (0, 0),
                     pipeline_mode=single),                                   # w1
        pl.BlockSpec((1, hidden_pad), lambda i, j: (0, 0),
                     pipeline_mode=single),                                   # b1
        pl.BlockSpec((hidden_pad, tn), lambda i, j: (0, j),
                     pipeline_mode=w2_mode),                                  # w2
        pl.BlockSpec((1, tn), lambda i, j: (0, j), pipeline_mode=w2_mode),    # b2
    ]
    out_spec = pl.BlockSpec((tm, tn), lambda i, j: (i, j))

    # ---- explicit VMEM budget (resident set + live intermediates, w/ headroom)
    out_bytes = jnp.dtype(out_dtype).itemsize
    halfp = _round_up(half, 128)
    est = (
        2 * tm * 128 * 4                                             # t tiles (lane padded, x2)
        + 8 * halfp * 4                                              # freqs
        + 2 * half * hidden_pad * 2                                  # w1 bf16 (single buffered)
        + 8 * hidden_pad * 4                                         # b1
        + (1 if n_col == 1 else 2) * (hidden_pad * tn * 2 + 8 * tn * 4)  # w2, b2
        + 2 * tm * tn * out_bytes                                    # out tiles (x2)
        + tm * hidden_pad * 2                                        # h scratch (bf16)
        + tm * 2 * half * 6 + tm * hidden_pad * 4 + tm * tn * 4      # live intermediates
    )
    try:
        vmem_cap = pltpu.get_tpu_info().vmem_capacity_bytes
    except Exception:
        vmem_cap = 64 << 20                   # smallest per-TC VMEM (v7x)
    vmem_limit = int(min(max(int(est * 1.5) + (4 << 20), 32 << 20),
                         int(vmem_cap * 0.85)))

    out_padded = pl.pallas_call(
        functools.partial(_timestep_embedder_kernel, bf16_silu=bf16_silu),
        out_shape=jax.ShapeDtypeStruct((n_pad, hp_out), out_dtype),
        grid=(n_pad // tm, n_col),
        in_specs=in_specs,
        out_specs=out_spec,
        scratch_shapes=[pltpu.VMEM((tm, hidden_pad), jnp.bfloat16)],   # h = SiLU(layer1)
        compiler_params=pltpu.CompilerParams(
            dimension_semantics=("parallel", "arbitrary"),
            vmem_limit_bytes=vmem_limit),
    )(t2d, freqs, w1p, b1p, w2p, b2p)

    return out_padded[:n, :hidden]


def reference_timestep_embedder(t, w1, b1, w2, b2,
                                frequency_embedding_size=256, max_period=10000):
    """Pure-JAX f32 reference mirroring the PyTorch module."""
    half = frequency_embedding_size // 2
    freqs = jnp.exp(-math.log(max_period) *
                    jnp.arange(half, dtype=jnp.float32) / half)
    args = t.astype(jnp.float32)[:, None] * freqs[None]
    emb = jnp.concatenate([jnp.cos(args), jnp.sin(args)], axis=-1)
    h = emb @ w1 + b1
    h = h * jax.nn.sigmoid(h)
    return h @ w2 + b2


if __name__ == "__main__":
    hidden_size = 32
    freq_size = 256
    n = 8

    key = jax.random.PRNGKey(0)
    k_t, k_w1, k_b1, k_w2, k_b2 = jax.random.split(key, 5)

    # Parameters stored as (in, out) / (1, out) — transposed vs nn.Linear.
    w1 = jax.random.normal(k_w1, (freq_size, hidden_size), jnp.float32) * 0.02
    b1 = jax.random.normal(k_b1, (1, hidden_size), jnp.float32) * 0.02
    w2 = jax.random.normal(k_w2, (hidden_size, hidden_size), jnp.float32) * 0.02
    b2 = jax.random.normal(k_b2, (1, hidden_size), jnp.float32) * 0.02

    t = jax.random.uniform(k_t, (n,), jnp.float32) * 1000.0

    out = timestep_embedder(t, w1, b1, w2, b2,
                            frequency_embedding_size=freq_size)
    out = jax.block_until_ready(out)

    ref = reference_timestep_embedder(t, w1, b1, w2, b2, freq_size)
    assert out.shape == (n, hidden_size)
    # bf16 MXU inputs / bf16 SiLU -> compare at bf16-appropriate tolerance.
    assert jnp.allclose(out, ref, atol=2e-2, rtol=2e-2), "mismatch vs reference"

    # TODO(synk): for production, fuse this embedder with its consumer
    # (e.g. adaLN modulation) — the standalone call is launch/DMA dominated.
    print("KERNEL_OK")
</pallas_src>

<mosaic_0001>
module attributes {stable_mosaic.version = 11 : i64} {
  func.func @_timestep_embedder_kernel(%arg0: i32, %arg1: i32, %arg2: memref<16x1xf32, #tpu.memory_space<vmem>>, %arg3: memref<1x128xf32, #tpu.memory_space<vmem>>, %arg4: memref<256x128xbf16, #tpu.memory_space<vmem>>, %arg5: memref<1x128xf32, #tpu.memory_space<vmem>>, %arg6: memref<128x128xbf16, #tpu.memory_space<vmem>>, %arg7: memref<1x128xf32, #tpu.memory_space<vmem>>, %arg8: memref<16x128xf32, #tpu.memory_space<vmem>>, %arg9: memref<16x128xbf16, #tpu.memory_space<vmem>>) attributes {dimension_semantics = [#tpu.dimension_semantics<parallel>, #tpu.dimension_semantics<arbitrary>], iteration_bounds = array<i64: 1, 1>, scalar_prefetch = 0 : i64, scratch_operands = 1 : i64, tpu.core_type = #tpu.core_type<tc>, window_params = [{transform_indices = @transform_0, window_bounds = array<i64: 16, 1>}, {pipeline_mode = #tpu.pipeline_mode<synchronous>, transform_indices = @transform_1, window_bounds = array<i64: 1, 128>}, {pipeline_mode = #tpu.pipeline_mode<synchronous>, transform_indices = @transform_2, window_bounds = array<i64: 256, 128>}, {pipeline_mode = #tpu.pipeline_mode<synchronous>, transform_indices = @transform_3, window_bounds = array<i64: 1, 128>}, {pipeline_mode = #tpu.pipeline_mode<synchronous>, transform_indices = @transform_4, window_bounds = array<i64: 128, 128>}, {pipeline_mode = #tpu.pipeline_mode<synchronous>, transform_indices = @transform_5, window_bounds = array<i64: 1, 128>}, {transform_indices = @transform_6, window_bounds = array<i64: 16, 128>}]} {
    %c0_i32 = arith.constant 0 : i32
    %0 = arith.cmpi eq, %arg1, %c0_i32 : i32
    %1 = arith.extui %0 : i1 to i32
    %c0_i32_0 = arith.constant 0 : i32
    %2 = arith.cmpi ne, %1, %c0_i32_0 : i32
    scf.if %2 {
      %c0_8 = arith.constant 0 : index
      %c0_9 = arith.constant 0 : index
      %10 = vector.load %arg2[%c0_8, %c0_9] : memref<16x1xf32, #tpu.memory_space<vmem>>, vector<16x1xf32>
      %c0_10 = arith.constant 0 : index
      %c0_11 = arith.constant 0 : index
      %11 = vector.load %arg3[%c0_10, %c0_11] : memref<1x128xf32, #tpu.memory_space<vmem>>, vector<1x128xf32>
      %12 = vector.broadcast %10 : vector<16x1xf32> to vector<16x128xf32>
      %13 = vector.broadcast %11 : vector<1x128xf32> to vector<16x128xf32>
      %14 = arith.mulf %12, %13 : vector<16x128xf32>
      %15 = math.cos %14 : vector<16x128xf32>
      %16 = math.sin %14 : vector<16x128xf32>
      %17 = tpu.concatenate %15, %16 in 1 : vector<16x128xf32>, vector<16x128xf32> -> vector<16x256xf32>
      %18 = arith.truncf %17 : vector<16x256xf32> to vector<16x256xbf16>
      %c0_12 = arith.constant 0 : index
      %c0_13 = arith.constant 0 : index
      %19 = vector.load %arg4[%c0_12, %c0_13] : memref<256x128xbf16, #tpu.memory_space<vmem>>, vector<256x128xbf16>
      %cst_14 = arith.constant dense<0.000000e+00> : vector<16x128xf32>
      %20 = tpu.matmul %18, %19, %cst_14 {dimension_numbers = #tpu.dot_dimension_numbers<[1], [0], [0], [1], [0, 0, 1, 1], [], []>} : vector<16x256xbf16>, vector<256x128xbf16>, vector<16x128xf32> -> vector<16x128xf32>
      %c0_15 = arith.constant 0 : index
      %c0_16 = arith.constant 0 : index
      %21 = vector.load %arg5[%c0_15, %c0_16] : memref<1x128xf32, #tpu.memory_space<vmem>>, vector<1x128xf32>
      %22 = vector.broadcast %21 : vector<1x128xf32> to vector<16x128xf32>
      %23 = arith.addf %20, %22 : vector<16x128xf32>
      %24 = arith.negf %23 : vector<16x128xf32>
      %25 = math.exp %24 : vector<16x128xf32>
      %cst_17 = arith.constant 1.000000e+00 : f32
      %26 = vector.broadcast %cst_17 : f32 to vector<16x128xf32>
      %27 = arith.addf %26, %25 : vector<16x128xf32>
      %28 = arith.divf %26, %27 : vector<16x128xf32>
      %29 = arith.mulf %23, %28 : vector<16x128xf32>
      %30 = arith.truncf %29 : vector<16x128xf32> to vector<16x128xbf16>
      %c0_18 = arith.constant 0 : index
      %c0_19 = arith.constant 0 : index
      %31 = vector.load %arg9[%c0_18, %c0_19] : memref<16x128xbf16, #tpu.memory_space<vmem>>, vector<16x128xbf16>
      tpu.vector_store %arg9[%c0_18, %c0_19], %30 {strides = array<i32>} : memref<16x128xbf16, #tpu.memory_space<vmem>>, vector<16x128xbf16>,
    } else {
    }
    %c0 = arith.constant 0 : index
    %c0_1 = arith.constant 0 : index
    %3 = vector.load %arg9[%c0, %c0_1] : memref<16x128xbf16, #tpu.memory_space<vmem>>, vector<16x128xbf16>
    %c0_2 = arith.constant 0 : index
    %c0_3 = arith.constant 0 : index
    %4 = vector.load %arg6[%c0_2, %c0_3] : memref<128x128xbf16, #tpu.memory_space<vmem>>, vector<128x128xbf16>
    %cst = arith.constant dense<0.000000e+00> : vector<16x128xf32>
    %5 = tpu.matmul %3, %4, %cst {dimension_numbers = #tpu.dot_dimension_numbers<[1], [0], [0], [1], [0, 0, 1, 1], [], []>} : vector<16x128xbf16>, vector<128x128xbf16>, vector<16x128xf32> -> vector<16x128xf32>
    %c0_4 = arith.constant 0 : index
    %c0_5 = arith.constant 0 : index
    %6 = vector.load %arg7[%c0_4, %c0_5] : memref<1x128xf32, #tpu.memory_space<vmem>>, vector<1x128xf32>
    %7 = vector.broadcast %6 : vector<1x128xf32> to vector<16x128xf32>
    %8 = arith.addf %5, %7 : vector<16x128xf32>
    %c0_6 = arith.constant 0 : index
    %c0_7 = arith.constant 0 : index
    %9 = vector.load %arg8[%c0_6, %c0_7] : memref<16x128xf32, #tpu.memory_space<vmem>>, vector<16x128xf32>
    tpu.vector_store %arg8[%c0_6, %c0_7], %8 {strides = array<i32>} : memref<16x128xf32, #tpu.memory_space<vmem>>, vector<16x128xf32>,
    return
  }
  func.func @transform_0(%arg0: i32, %arg1: i32) -> (i32, i32) {
    %c0_i32 = arith.constant 0 : i32
    %c0_i32_0 = arith.constant 0 : i32
    return %arg0, %c0_i32 : i32, i32
  }
  func.func @transform_1(%arg0: i32, %arg1: i32) -> (i32, i32) {
    %c0_i32 = arith.constant 0 : i32
    %c0_i32_0 = arith.constant 0 : i32
    %c0_i32_1 = arith.constant 0 : i32
    return %c0_i32, %c0_i32_0 : i32, i32
  }
  func.func @transform_2(%arg0: i32, %arg1: i32) -> (i32, i32) {
    %c0_i32 = arith.constant 0 : i32
    %c0_i32_0 = arith.constant 0 : i32
    %c0_i32_1 = arith.constant 0 : i32
    return %c0_i32, %c0_i32_0 : i32, i32
  }
  func.func @transform_3(%arg0: i32, %arg1: i32) -> (i32, i32) {
    %c0_i32 = arith.constant 0 : i32
    %c0_i32_0 = arith.constant 0 : i32
    %c0_i32_1 = arith.constant 0 : i32
    return %c0_i32, %c0_i32_0 : i32, i32
  }
  func.func @transform_4(%arg0: i32, %arg1: i32) -> (i32, i32) {
    %c0_i32 = arith.constant 0 : i32
    %c0_i32_0 = arith.constant 0 : i32
    return %c0_i32, %arg1 : i32, i32
  }
  func.func @transform_5(%arg0: i32, %arg1: i32) -> (i32, i32) {
    %c0_i32 = arith.constant 0 : i32
    %c0_i32_0 = arith.constant 0 : i32
    return %c0_i32, %arg1 : i32, i32
  }
  func.func @transform_6(%arg0: i32, %arg1: i32) -> (i32, i32) {
    %c0_i32 = arith.constant 0 : i32
    return %arg0, %arg1 : i32, i32
  }
}

</mosaic_0001>

<bundles_post_ra>
// kernel: tpu_custom_call.1
= control target key start
LH: loop header
LB: loop body
LE: loop exit
PB: predicated region body
PF: predicated region fallthrough
CT: control target
= control target key end

     0   :  { %11 = vsyncpa [#allocation4], 0  ;;  %s1549_s0 = inlined_call_operand.vmem [shape: f32[16,1], index: 0, kind: input, shape index: {}]   ;;  %s1550_s1 = inlined_call_operand.vmem [shape: f32[1,128], index: 1, kind: input, shape index: {}]   ;;  %s1551_s2 = inlined_call_operand.hbm [shape: bf16[256,128], index: 2, kind: input, shape index: {}]   ;;  %s1552_s3 = inlined_call_operand.vmem [shape: f32[1,128], index: 3, kind: input, shape index: {}]   ;;  %s1553_s4 = inlined_call_operand.hbm [shape: bf16[128,128], index: 4, kind: input, shape index: {}]   ;;  %s1554_s5 = inlined_call_operand.vmem [shape: f32[1,128], index: 5, kind: input, shape index: {}]   ;;  %s1555_s6 = inlined_call_operand.hbm [shape: f32[16,128], index: 6, kind: output, shape index: {}]  }
   0x1   :  { %12 = vsyncpa [#allocation7], 0 }
   0x2   :  { %13 = vsyncpa [#allocation5], 0  ;;  %s22_s23 = sshll.u32 %s1551_s2, 4  ;;  %s1262_s24 = smov [#allocation3]   ;;  %s23_s23 = int_to_ptr.hbm [resolvable:$true] %s22_s23 }
   0x3   :  { %s24_s25 = sshll.u32 %s1262_s24, 4  ;;  %s37_s28 = sshll.u32 %s1553_s4, 4  ;;  %s25_s25 = int_to_ptr.vmem [resolvable:$true] %s24_s25  ;;  %s38_s28 = int_to_ptr.hbm [resolvable:$true] %s37_s28 }
   0x4   :  { %s1263_s29 = smov 64   ;;  %s1264_s30 = smov 4  }
   0x5   :  { %30 = dma.hbm_to_vmem [thread:$0]  %s23_s23, 2048, %s25_s25, [#allocation4], %s1263_s29, %s1263_s29, %s1264_s30  }
   0x6   :  { %s1265_s7 = smov [#allocation6]  }
   0x7   :  { %s39_s8 = sshll.u32 %s1265_s7, 4  ;;  %s40_s8 = int_to_ptr.vmem [resolvable:$true] %s39_s8 }
   0x8   :  { %45 = dma.hbm_to_vmem [thread:$0]  %s38_s28, 1024, %s40_s8, [#allocation7], %s1263_s29, %s1263_s29, %s1264_s30  }
   0x9   :  { %1256 = dma.done.wait [#allocation4], 2048  }
   0xa   :  { %1257 = vsyncadd [#allocation4], 4294965248 }
   0xb   :  { %1258 = dma.done.wait [#allocation7], 1024  }
   0xc   :  { %1259 = vsyncadd [#allocation7], 4294966272  ;;  %v1266_v0 = vmov 0   ;;  %v60_v1 = vld [vmem:[%s1549_s0] sm:$0xff]  ;;  %v61_v2 = vld [vmem:[%s1549_s0 + $0x8] sm:$0xff]  ;;  %s1273_s14 = smov [#allocation8]  }
   0xd   :  { %1172 = vset.pattern.permute.xlu0 %v1266_v0  ;;  %v1173_v3 = vld [vmem:[%s1550_s1] ss:$0 sm:$0xff]  ;;  %v1267_v25 = vmov 683565275   ;;  %v1268_v27 = vmov 2475754826  }
   0xe   :  { %65 = vperm.xlu0 %1172, %v60_v1   ;;  %v1135_v19 = vld [vmem:[#allocation3 + $0x38] sm:$0xff]  ;;  %v1134_v30 = vld [vmem:[#allocation3 + $0x30] sm:$0xff]  ;;  %v1269_v33 = vmov 2131351028   ;;  %v1270_v36 = vmov 2102212464  }
   0xf   :  { %v1143_v20 = vld [vmem:[#allocation3 + $0x78] sm:$0xff]  ;;  %830 = vmatpush.bf16.msra.mxu0 %v1135_v19  ;;  %v1142_v31 = vld [vmem:[#allocation3 + $0x70] sm:$0xff]  ;;  %v1271_v39 = vmov 920167782   ;;  %v1272_v42 = vmov 1326507024  }
  0x10   :  { %844 = vmatpush.bf16.msra.mxu1 %v1143_v20  ;;  %v1133_v50 = vld [vmem:[#allocation3 + $0x28] sm:$0xff]  ;;  %v1132_v63 = vld [vmem:[#allocation3 + $0x20] sm:$0xff]  ;;  %s998_s15 = sshll.u32 %s1273_s14, 4  ;;  %s1000_s18 = sshll.u32 %s1555_s6, 4  ;;  %s999_s15 = int_to_ptr.vmem [resolvable:$true] %s998_s15  ;;  %s1001_s18 = int_to_ptr.hbm [resolvable:$true] %s1000_s18 }
  0x11   :  { %v1141_v51 = vld [vmem:[#allocation3 + $0x68] sm:$0xff]  ;;  %v1140_v1 = vld [vmem:[#allocation3 + $0x60] sm:$0xff]  ;;  %s1274_s19 = smov 128   ;;  %s1275_s20 = smov 8  }
  0x13   :  { %831 = vmatpush.bf16.msra.mxu0 %v1134_v30 }
  0x14   :  { %845 = vmatpush.bf16.msra.mxu1 %v1142_v31 }
  0x16   :  { %70 = vperm.xlu0 %1172, %v61_v2  }
  0x17   :  { %832 = vmatpush.bf16.msra.mxu0 %v1133_v50 }
  0x18   :  { %846 = vmatpush.bf16.msra.mxu1 %v1141_v51 }
  0x1b   :  { %833 = vmatpush.bf16.msra.mxu0 %v1132_v63 }
  0x1c   :  { %847 = vmatpush.bf16.msra.mxu1 %v1140_v1 }
  0x80   :  { %v66_v4 = vpop.permute.xlu0 %65 }
  0x81   :  { %v1327_v5 = vmul.f32 %v1173_v3, %v66_v4 }
  0x83   :  { %v78_v6 = vand.u32 2147483647, %v1327_v5  ;;  %v81_v7 = vand.u32 2139095040, %v1327_v5 }
  0x85   :  { %v82_v8 = vshrl.u32 %v81_v7, 23  ;;  %v85_v10 = vand.u32 8388607, %v78_v6 }
  0x87   :  { %v1014_v9 = vadd.s32 4294967169, %v82_v8  ;;  %v86_v14 = vor.u32 8388608, %v85_v10 }
  0x88   :  { %v71_v11 = vpop.permute.xlu0 %70 }
  0x89   :  { %v88_v12 = vadd.s32 1, %v1014_v9  ;;  %v1333_v13 = vmul.f32 %v1173_v3, %v71_v11  ;;  %v1337_v22 = vshll.u32 %v86_v14, 8 }
  0x8b   :  { %vm89_vm0 = vcmp.gt.s32.totalorder %v88_v12, 0  ;;  %v232_v16 = vand.u32 2147483647, %v1333_v13  ;;  %v235_v17 = vand.u32 2139095040, %v1333_v13  ;;  %v1373_v4 = vand.u32 65535, %v1337_v22 }
  0x8c   :  { %v90_v15 = vsel %vm89_vm0, %v88_v12, 0  ;;  %v1385_v14 = vshrl.u32 %v1337_v22, 16 }
  0x8d   :  { %v92_v18 = vand.u32 31, %v90_v15  ;;  %v236_v23 = vshrl.u32 %v235_v17, 23  ;;  %v1339_v24 = vshrl.u32 %v90_v15, 5  ;;  %v239_v29 = vand.u32 8388607, %v232_v16  ;;  %v1131_v17 = vld [vmem:[#allocation3 + $0x18] sm:$0xff] }
  0x8e   :  { %834 = vmatpush.bf16.msra.mxu0 %v1131_v17 }
  0x8f   :  { %v93_v21 = vsub.s32 32, %v92_v18  ;;  %v95_v26 = vshll.u32 %v1267_v25, %v92_v18  ;;  %v98_v28 = vshll.u32 %v1268_v27, %v92_v18  ;;  %v101_v35 = vshll.u32 %v1269_v33, %v92_v18 }
  0x90   :  { %v104_v38 = vshll.u32 %v1270_v36, %v92_v18  ;;  %v107_v41 = vshll.u32 %v1271_v39, %v92_v18  ;;  %v1017_v47 = vadd.s32 4294967169, %v236_v23  ;;  %vm110_vm1 = vcmp.lt.s32.totalorder %v1339_v24, 1 }
  0x91   :  { %v96_v32 = vshrl.u32 %v1268_v27, %v93_v21  ;;  %v99_v34 = vshrl.u32 %v1269_v33, %v93_v21  ;;  %v102_v37 = vshrl.u32 %v1270_v36, %v93_v21  ;;  %v105_v40 = vshrl.u32 %v1271_v39, %v93_v21 }
  0x92   :  { %v108_v43 = vshrl.u32 %v1272_v42, %v93_v21  ;;  %vm113_vm2 = vcmp.lt.s32.totalorder %v1339_v24, 4  ;;  %vm111_vm3 = vcmp.lt.s32.totalorder %v1339_v24, 2  ;;  %vm112_vm4 = vcmp.lt.s32.totalorder %v1339_v24, 3 }
  0x93   :  { %v97_v44 = vor.u32 %v96_v32, %v95_v26  ;;  %v100_v45 = vor.u32 %v99_v34, %v98_v28  ;;  %v103_v46 = vor.u32 %v102_v37, %v101_v35  ;;  %v106_v48 = vor.u32 %v105_v40, %v104_v38  ;;  %v1130_v40 = vld [vmem:[#allocation3 + $0x10] sm:$0xff] }
  0x94   :  { %v109_v49 = vor.u32 %v108_v43, %v107_v41  ;;  %v240_v56 = vor.u32 8388608, %v239_v29  ;;  %v242_v57 = vadd.s32 1, %v1017_v47  ;;  %v94_v58 = vshrl.u32 %v1267_v25, %v93_v21  ;;  %v1139_v21 = vld [vmem:[#allocation3 + $0x58] sm:$0xff]  ;;  %835 = vmatpush.bf16.msra.mxu0 %v1130_v40 }
  0x95   :  { %v115_v52 = vsel %vm113_vm2, %v103_v46, 2102212464  ;;  %v122_v53 = vsel %vm110_vm1, %v100_v45, %v103_v46  ;;  %v119_v54 = vsel %vm113_vm2, %v106_v48, 920167782  ;;  %v118_v59 = vsel %vm110_vm1, %v97_v44, %v100_v45  ;;  %848 = vmatpush.bf16.msra.mxu1 %v1139_v21 }
  0x96   :  { %v123_v55 = vsel %vm113_vm2, %v109_v49, 1326507024  ;;  %v120_v60 = vsel %vm112_vm4, %v103_v46, %v119_v54  ;;  %vm243_vm5 = vcmp.gt.s32.totalorder %v242_v57, 0  ;;  %v114_v2 = vsel %vm110_vm1, %v94_v58, %v97_v44 }
  0x97   :  { %v124_v61 = vsel %vm112_vm4, %v106_v48, %v123_v55  ;;  %v116_v3 = vsel %vm112_vm4, %v100_v45, %v115_v52  ;;  %v1377_v8 = vsel %vm111_vm3, %v118_v59, %v120_v60  ;;  %v244_v10 = vsel %vm243_vm5, %v242_v57, 0  ;;  %v1138_v45 = vld [vmem:[#allocation3 + $0x50] sm:$0xff]  ;;  %v1129_v52 = vld [vmem:[#allocation3 + $0x8] sm:$0xff] }
  0x98   :  { %v125_v62 = vsel %vm111_vm3, %v122_v53, %v124_v61  ;;  %v1379_v11 = vshll.u32 %v240_v56, 8  ;;  %v246_v15 = vand.u32 31, %v244_v10  ;;  %v1389_v18 = vsel %vm111_vm3, %v114_v2, %v116_v3  ;;  %v1137_v56 = vld [vmem:[#allocation3 + $0x48] sm:$0xff]  ;;  %836 = vmatpush.bf16.msra.mxu0 %v1129_v52 }
  0x99   :  { %v130_v7 = vshrl.u32 %v125_v62, 16  ;;  %v129_v9 = vand.u32 65535, %v125_v62  ;;  %v151_v19 = vand.u32 65535, %v1377_v8  ;;  %v152_v20 = vshrl.u32 %v1377_v8, 16  ;;  %849 = vmatpush.bf16.msra.mxu1 %v1138_v45 }
  0x9a   :  { %v1395_v28 = vsub.s32 32, %v246_v15  ;;  %v1398_v29 = vand.u32 65535, %v1379_v11  ;;  %v1401_v31 = vshrl.u32 %v244_v10, 5  ;;  %v249_v24 = vshll.u32 %v1267_v25, %v246_v15  ;;  %v1136_v10 = vld [vmem:[#allocation3 + $0x40] sm:$0xff] }
  0x9b   :  { %v1382_v12 = vmul.u32 %v130_v7, %v1373_v4  ;;  %v131_v23 = vmul.u32 %v129_v9, %v1373_v4  ;;  %v134_v26 = vmul.u32 %v130_v7, %v1385_v14  ;;  %v252_v32 = vshll.u32 %v1268_v27, %v246_v15  ;;  %v1128_v7 = vld [vmem:[#allocation3] sm:$0xff] }
  0x9c   :  { %v250_v34 = vshrl.u32 %v1268_v27, %v1395_v28  ;;  %v253_v35 = vshrl.u32 %v1269_v33, %v1395_v28  ;;  %v255_v37 = vshll.u32 %v1269_v33, %v246_v15  ;;  %v256_v38 = vshrl.u32 %v1270_v36, %v1395_v28  ;;  %837 = vmatpush.bf16.msra.mxu0 %v1128_v7 }
  0x9d   :  { %v135_v30 = vshll.u32 %v1382_v12, 16  ;;  %v258_v41 = vshll.u32 %v1270_v36, %v246_v15  ;;  %v259_v43 = vshrl.u32 %v1271_v39, %v1395_v28  ;;  %v261_v44 = vshll.u32 %v1271_v39, %v246_v15  ;;  %850 = vmatpush.bf16.msra.mxu1 %v1137_v56 }
  0x9e   :  { %v262_v27 = vshrl.u32 %v1272_v42, %v1395_v28  ;;  %v1418_v46 = vor.u32 %v250_v34, %v249_v24  ;;  %v1420_v33 = vor.u32 %v253_v35, %v252_v32  ;;  %v1422_v47 = vor.u32 %v256_v38, %v255_v37 }
  0x9f   :  { %v1425_v48 = vmul.u32 %v129_v9, %v1385_v14  ;;  %vm1427_vm6 = vc.u32 %v131_v23, %v135_v30  ;;  %v260_v49 = vor.u32 %v259_v43, %v258_v41  ;;  %vm264_vm7 = vcmp.lt.s32.totalorder %v1401_v31, 1 }
  0xa0   :  { %v263_v39 = vor.u32 %v262_v27, %v261_v44  ;;  %v1433_v42 = vmul.u32 %v152_v20, %v1373_v4  ;;  %vm267_vm8 = vcmp.lt.s32.totalorder %v1401_v31, 4  ;;  %v272_v50 = vsel %vm264_vm7, %v1418_v46, %v1420_v33 }
  0xa1   :  { %v276_v51 = vsel %vm264_vm7, %v1420_v33, %v1422_v47  ;;  %v141_v53 = vadd.s32 %v135_v30, %v131_v23  ;;  %vm266_vm9 = vcmp.lt.s32.totalorder %v1401_v31, 3  ;;  %v273_v54 = vsel %vm267_vm8, %v260_v49, 920167782  ;;  %851 = vmatpush.bf16.msra.mxu1 %v1136_v10 }
  0xa2   :  { %v277_v55 = vsel %vm267_vm8, %v263_v39, 1326507024  ;;  %vm265_vm10 = vcmp.lt.s32.totalorder %v1401_v31, 2  ;;  %v274_v57 = vsel %vm266_vm9, %v1422_v47, %v273_v54  ;;  %v140_v59 = vsel %vm1427_vm6, 1, %v1266_v0 }
  0xa3   :  { %v278_v58 = vsel %vm266_vm9, %v260_v49, %v277_v55  ;;  %v275_v60 = vsel %vm265_vm10, %v272_v50, %v274_v57  ;;  %v137_v62 = vshll.u32 %v1425_v48, 16  ;;  %v155_v63 = vmul.u32 %v151_v19, %v1385_v14 }
  0xa4   :  { %v279_v61 = vsel %vm265_vm10, %v276_v51, %v278_v58  ;;  %v282_v1 = vshrl.u32 %v1379_v11, 16  ;;  %v142_v8 = vadd.s32 %v140_v59, %v134_v26  ;;  %v306_v9 = vshrl.u32 %v275_v60, 16 }
  0xa5   :  { %v283_v2 = vand.u32 65535, %v279_v61  ;;  %v284_v3 = vshrl.u32 %v279_v61, 16  ;;  %vm143_vm11 = vc.u32 %v141_v53, %v137_v62  ;;  %v153_v15 = vmul.u32 %v151_v19, %v1373_v4 }
  0xa6   :  { %v157_v17 = vshll.u32 %v1433_v42, 16  ;;  %v156_v21 = vmul.u32 %v152_v20, %v1385_v14  ;;  %v305_v30 = vand.u32 65535, %v275_v60  ;;  %v136_v24 = vshrl.u32 %v1382_v12, 16 }
  0xa7   :  { %v286_v23 = vmul.u32 %v284_v3, %v1398_v29  ;;  %v285_v32 = vmul.u32 %v283_v2, %v1398_v29  ;;  %v144_v34 = vsel %vm143_vm11, 1, %v1266_v0  ;;  %v159_v26 = vshll.u32 %v155_v63, 16 }
  0xa8   :  { %vm161_vm12 = vc.u32 %v153_v15, %v157_v17  ;;  %v146_v37 = vadd.s32 %v144_v34, %v142_v8  ;;  %v163_v19 = vadd.s32 %v157_v17, %v153_v15  ;;  %v308_v38 = vmul.u32 %v306_v9, %v1398_v29 }
  0xa9   :  { %v289_v35 = vshll.u32 %v286_v23, 16  ;;  %v162_v4 = vsel %vm161_vm12, 1, %v1266_v0  ;;  %v138_v14 = vshrl.u32 %v1425_v48, 16  ;;  %v287_v40 = vmul.u32 %v283_v2, %v282_v1 }
  0xaa   :  { %v164_v20 = vadd.s32 %v162_v4, %v156_v21  ;;  %v147_v41 = vadd.s32 %v146_v37, %v136_v24  ;;  %vm165_vm14 = vc.u32 %v163_v19, %v159_v26  ;;  %v288_v43 = vmul.u32 %v284_v3, %v282_v1 }
  0xab   :  { %vm293_vm13 = vc.u32 %v285_v32, %v289_v35  ;;  %v295_v12 = vadd.s32 %v289_v35, %v285_v32  ;;  %v158_v44 = vshrl.u32 %v1433_v42, 16  ;;  %v166_v27 = vsel %vm165_vm14, 1, %v1266_v0 }
  0xac   :  { %v291_v45 = vshll.u32 %v287_v40, 16  ;;  %v168_v36 = vadd.s32 %v166_v27, %v164_v20  ;;  %v294_v49 = vsel %vm293_vm13, 1, %v1266_v0  ;;  %v307_v39 = vmul.u32 %v305_v30, %v1398_v29 }
  0xad   :  { %v309_v50 = vmul.u32 %v305_v30, %v282_v1  ;;  %v148_v51 = vadd.s32 %v147_v41, %v138_v14  ;;  %v296_v48 = vadd.s32 %v294_v49, %v288_v43  ;;  %v311_v52 = vshll.u32 %v308_v38, 16 }
  0xae   :  { %vm297_vm15 = vc.u32 %v295_v12, %v291_v45  ;;  %v310_v53 = vmul.u32 %v306_v9, %v282_v1  ;;  %v160_v54 = vshrl.u32 %v155_v63, 16  ;;  %v169_v55 = vadd.s32 %v168_v36, %v158_v44 }
  0xaf   :  { %v298_v56 = vsel %vm297_vm15, 1, %v1266_v0  ;;  %v167_v57 = vadd.s32 %v163_v19, %v159_v26  ;;  %v290_v42 = vshrl.u32 %v286_v23, 16  ;;  %vm315_vm0 = vc.u32 %v307_v39, %v311_v52 }
  0xb0   :  { %v300_v58 = vadd.s32 %v298_v56, %v296_v48  ;;  %v170_v59 = vadd.s32 %v169_v55, %v160_v54  ;;  %v313_v60 = vshll.u32 %v309_v50, 16  ;;  %v316_v61 = vsel %vm315_vm0, 1, %v1266_v0 }
  0xb1   :  { %v317_v62 = vadd.s32 %v311_v52, %v307_v39  ;;  %vm173_vm1 = vc.u32 %v148_v51, %v167_v57  ;;  %v318_v2 = vadd.s32 %v316_v61, %v310_v53  ;;  %v269_v1 = vsel %vm267_vm8, %v1422_v47, 2102212464 }
  0xb2   :  { %v301_v29 = vadd.s32 %v300_v58, %v290_v42  ;;  %v174_v63 = vadd.s32 1, %v170_v59  ;;  %v171_v3 = vmul.u32 %v1337_v22, %v1389_v18  ;;  %v248_v7 = vshrl.u32 %v1267_v25, %v1395_v28 }
  0xb3   :  { %vm319_vm2 = vc.u32 %v317_v62, %v313_v60  ;;  %v292_v8 = vshrl.u32 %v287_v40, 16  ;;  %v312_v15 = vshrl.u32 %v308_v38, 16  ;;  %v270_v47 = vsel %vm266_vm9, %v1420_v33, %v269_v1 }
  0xb4   :  { %v320_v9 = vsel %vm319_vm2, 1, %v1266_v0  ;;  %v175_v10 = vsel %vm173_vm1, %v174_v63, %v170_v59  ;;  %v268_v21 = vsel %vm264_vm7, %v248_v7, %v1418_v46  ;;  %v314_v22 = vshrl.u32 %v309_v50, 16 }
  0xb5   :  { %v322_v17 = vadd.s32 %v320_v9, %v318_v2  ;;  %v176_v23 = vadd.s32 %v175_v10, %v171_v3  ;;  %v302_v30 = vadd.s32 %v301_v29, %v292_v8  ;;  %v321_v25 = vadd.s32 %v317_v62, %v313_v60 }
  0xb6   :  { %v271_v0 = vsel %vm265_vm10, %v268_v21, %v270_v47  ;;  %v172_v43 = vadd.s32 %v167_v57, %v148_v51  ;;  %vm80_vm8 = vcmp.lt.s32.totalorder %v1327_v5, 0  ;;  %vm1507_vm9 = vcmp.le.f32.partialorder %v78_v6, 0.7853982 }
  0xb7   :  { %v323_v18 = vadd.s32 %v322_v17, %v312_v15  ;;  %v177_v24 = vadd.s32 536870912, %v176_v23  ;;  %vm327_vm3 = vc.u32 %v302_v30, %v321_v25  ;;  %v325_v46 = vmul.u32 %v1379_v11, %v271_v0 }
  0xb8   :  { %v326_v59 = vadd.s32 %v321_v25, %v302_v30  ;;  %vm234_vm10 = vcmp.lt.s32.totalorder %v1333_v13, 0  ;;  %vm1520_vm11 = vcmp.le.f32.partialorder %v232_v16, 0.7853982 }
  0xb9   :  { %v324_v28 = vadd.s32 %v323_v18, %v314_v22  ;;  %v1497_v32 = vshrl.u32 %v177_v24, 30 }
  0xbb   :  { %v328_v34 = vadd.s32 1, %v324_v28  ;;  %v179_v26 = vshll.u32 %v1497_v32, 30  ;;  %v202_v6 = vsub.s32 4, %v1497_v32 }
  0xbd   :  { %v329_v35 = vsel %vm327_vm3, %v328_v34, %v324_v28  ;;  %v180_v33 = vsub.s32 %v176_v23, %v179_v26  ;;  %v203_v0 = vsel %vm80_vm8, %v202_v6, %v1497_v32 }
  0xbe   :  { %v330_v37 = vadd.s32 %v329_v35, %v325_v46  ;;  %v205_v16 = vsel %vm1507_vm9, 0, %v203_v0  ;;  %v1149_v0 = vld [vmem:[#allocation6 + $0x20] sm:$0xff] }
  0xbf   :  { %vm181_vm4 = vcmp.lt.s32.totalorder %v180_v33, 0  ;;  %v182_v4 = vsub.s32 0, %v180_v33 }
  0xc0   :  { %v331_v19 = vadd.s32 536870912, %v330_v37 }
  0xc1   :  { %v183_v38 = vsel %vm181_vm4, %v182_v4, %v180_v33 }
  0xc2   :  { %v184_v14 = vclz %v183_v38  ;;  %v1501_v20 = vshrl.u32 %v331_v19, 30 }
  0xc4   :  { %v1015_v31 = vadd.s32 4294967294, %v184_v14  ;;  %v333_v40 = vshll.u32 %v1501_v20, 30  ;;  %v356_v46 = vsub.s32 4, %v1501_v20 }
  0xc6   :  { %vm1016_vm5 = vcmp.lt.s32.totalorder %v1015_v31, 0  ;;  %v334_v12 = vsub.s32 %v330_v37, %v333_v40  ;;  %v357_v19 = vsel %vm234_vm10, %v356_v46, %v1501_v20 }
  0xc7   :  { %v187_v41 = vsel %vm1016_vm5, 0, %v1015_v31 }
  0xc8   :  { %v188_v11 = vsub.s32 32, %v187_v41  ;;  %v192_v44 = vsub.s32 4294967266, %v187_v41  ;;  %vm335_vm6 = vcmp.lt.s32.totalorder %v334_v12, 0  ;;  %v336_v27 = vsub.s32 0, %v334_v12 }
  0xc9   :  { %v189_v45 = vshll.u32 %v180_v33, %v187_v41  ;;  %v530_v41 = vadd.s32 3, %v205_v16 }
  0xca   :  { %v190_v36 = vshrl.u32 %v172_v43, %v188_v11  ;;  %v193_v49 = vadd.s32 127, %v192_v44  ;;  %v337_v39 = vsel %vm335_vm6, %v336_v27, %v334_v12  ;;  %v222_v27 = vand.u32 3, %v205_v16 }
  0xcb   :  { %v338_v52 = vclz %v337_v39 }
  0xcc   :  { %v191_v50 = vor.u32 %v190_v36, %v189_v45  ;;  %v194_v48 = vshll.u32 %v193_v49, 23  ;;  %vm223_vm12 = vcmp.lt.s32.totalorder %v222_v27, 2  ;;  %vm224_vm13 = vcmp.eq.s32.totalorder %v222_v27, 0 }
  0xcd   :  { %v1018_v54 = vadd.s32 4294967294, %v338_v52  ;;  %vm227_vm14 = vcmp.eq.s32.totalorder %v222_v27, 2 }
  0xce   :  { %v195_v53 = vor.u32 4788187, %v194_v48  ;;  %v198_v56 = vcvt.s32.f32 %v191_v50  ;;  %v531_v50 = vand.u32 3, %v530_v41 }
  0xcf   :  { %vm1019_vm7 = vcmp.lt.s32.totalorder %v1018_v54, 0 }
  0xd0   :  { %v196_v55 = vand.u32 2147483647, %v195_v53  ;;  %v341_v42 = vsel %vm1019_vm7, 0, %v1018_v54  ;;  %vm532_vm15 = vcmp.lt.s32.totalorder %v531_v50, 2  ;;  %vm533_vm0 = vcmp.eq.s32.totalorder %v531_v50, 0 }
  0xd1   :  { %v342_v51 = vsub.s32 32, %v341_v42  ;;  %v346_v57 = vsub.s32 4294967266, %v341_v42  ;;  %v343_v61 = vshll.u32 %v334_v12, %v341_v42  ;;  %v359_v12 = vsel %vm1520_vm11, 0, %v357_v19  ;;  %v1146_v19 = vld [vmem:[#allocation6 + $0x8] sm:$0xff] }
  0xd2   :  { %v199_v58 = vmul.f32 %v198_v56, %v196_v55  ;;  %v685_v39 = vadd.s32 3, %v359_v12  ;;  %v376_v53 = vand.u32 3, %v359_v12  ;;  %vm536_vm4 = vcmp.eq.s32.totalorder %v531_v50, 2 }
  0xd3   :  { %v344_v62 = vshrl.u32 %v326_v59, %v342_v51  ;;  %v347_v29 = vadd.s32 127, %v346_v57 }
  0xd4   :  { %v200_v60 = vxor.u32 2147483648, %v199_v58  ;;  %v686_v42 = vand.u32 3, %v685_v39  ;;  %vm377_vm1 = vcmp.lt.s32.totalorder %v376_v53, 2  ;;  %vm378_vm2 = vcmp.eq.s32.totalorder %v376_v53, 0 }
  0xd5   :  { %v345_v63 = vor.u32 %v344_v62, %v343_v61  ;;  %v348_v3 = vshll.u32 %v347_v29, 23  ;;  %vm381_vm3 = vcmp.eq.s32.totalorder %v376_v53, 2 }
  0xd6   :  { %v201_v1 = vsel %vm80_vm8, %v200_v60, %v199_v58  ;;  %vm687_vm5 = vcmp.lt.s32.totalorder %v686_v42, 2  ;;  %vm688_vm6 = vcmp.eq.s32.totalorder %v686_v42, 0  ;;  %vm691_vm7 = vcmp.eq.s32.totalorder %v686_v42, 2 }
  0xd7   :  { %v204_v7 = vsel %vm1507_vm9, %v1327_v5, %v201_v1  ;;  %v349_v9 = vor.u32 4788187, %v348_v3  ;;  %v352_v21 = vcvt.s32.f32 %v345_v63  ;;  %vm221_vm8 = vweird.f32 %v1327_v5  ;;  %v1174_v5 = vld [vmem:[%s1552_s3] ss:$0 sm:$0xff] }
  0xd8   :  { %v206_v8 = vmul.f32 %v204_v7, %v204_v7  ;;  %vm375_vm9 = vweird.f32 %v1333_v13 }
  0xd9   :  { %v350_v17 = vand.u32 2147483647, %v349_v9 }
  0xda   :  { %v207_v10 = vmul.f32 -0.001358992, %v206_v8  ;;  %v214_v15 = vmul.f32 -0.00019511016, %v206_v8 }
  0xdb   :  { %v353_v30 = vmul.f32 %v352_v21, %v350_v17 }
  0xdc   :  { %v208_v47 = vadd.f32 0.041655596, %v207_v10  ;;  %v215_v23 = vadd.f32 0.008332121, %v214_v15 }
  0xdd   :  { %v354_v24 = vxor.u32 2147483648, %v353_v30 }
  0xde   :  { %v209_v22 = vmul.f32 %v208_v47, %v206_v8  ;;  %v216_v18 = vmul.f32 %v215_v23, %v206_v8  ;;  %v1152_v23 = vld [vmem:[#allocation6 + $0x38] sm:$0xff] }
  0xdf   :  { %v355_v34 = vsel %vm234_vm10, %v354_v24, %v353_v30  ;;  %978 = vmatpush.bf16.msra.mxu2 %v1152_v23  ;;  %v1151_v30 = vld [vmem:[#allocation6 + $0x30] sm:$0xff] }
  0xe0   :  { %v217_v28 = vadd.f32 -0.16666654, %v216_v18  ;;  %v358_v26 = vsel %vm1520_vm11, %v1333_v13, %v355_v34  ;;  %v210_v35 = vadd.f32 -0.4999988, %v209_v22  ;;  %v1150_v13 = vld [vmem:[#allocation6 + $0x28] sm:$0xff]  ;;  %v1148_v34 = vld [vmem:[#allocation6 + $0x18] sm:$0xff] }
  0xe1   :  { %v360_v37 = vmul.f32 %v358_v26, %v358_v26 }
  0xe2   :  { %v218_v33 = vmul.f32 %v217_v28, %v206_v8  ;;  %v211_v32 = vmul.f32 %v210_v35, %v206_v8 }
  0xe3   :  { %v361_v38 = vmul.f32 -0.001358992, %v360_v37  ;;  %v368_v14 = vmul.f32 -0.00019511016, %v360_v37  ;;  %979 = vmatpush.bf16.msra.mxu2 %v1151_v30 }
  0xe4   :  { %v219_v4 = vadd.f32 1.0, %v218_v33  ;;  %v212_v45 = vadd.f32 1.0, %v211_v32 }
  0xe5   :  { %v362_v31 = vadd.f32 0.041655596, %v361_v38  ;;  %v369_v40 = vadd.f32 0.008332121, %v368_v14  ;;  %v1145_v14 = vld [vmem:[#allocation6] sm:$0xff] }
  0xe6   :  { %v220_v43 = vmul.f32 %v219_v4, %v204_v7  ;;  %v228_v54 = vxor.u32 2147483648, %v212_v45 }
  0xe7   :  { %v363_v11 = vmul.f32 %v362_v31, %v360_v37  ;;  %v370_v44 = vmul.f32 %v369_v40, %v360_v37  ;;  %980 = vmatpush.bf16.msra.mxu2 %v1150_v13 }
  0xe8   :  { %v225_v48 = vxor.u32 2147483648, %v220_v43  ;;  %v229_v60 = vsel %vm227_vm14, %v228_v54, %v220_v43  ;;  %v538_v62 = vsel %vm536_vm4, %v228_v54, %v220_v43 }
  0xe9   :  { %v364_v36 = vadd.f32 -0.4999988, %v363_v11  ;;  %v371_v49 = vadd.f32 -0.16666654, %v370_v44 }
  0xea   :  { %v226_v58 = vsel %vm224_vm13, %v212_v45, %v225_v48  ;;  %v535_v57 = vsel %vm533_vm0, %v212_v45, %v225_v48 }
  0xeb   :  { %v365_v20 = vmul.f32 %v364_v36, %v360_v37  ;;  %v372_v52 = vmul.f32 %v371_v49, %v360_v37  ;;  %v230_v29 = vsel %vm223_vm12, %v226_v58, %v229_v60  ;;  %v539_v2 = vsel %vm532_vm15, %v535_v57, %v538_v62  ;;  %981 = vmatpush.bf16.msra.mxu2 %v1149_v0  ;;  %v1147_v37 = vld [vmem:[#allocation6 + $0x10] sm:$0xff]  ;;  %v1175_v60 = vld [vmem:[%s1554_s5] ss:$0 sm:$0xff] }
  0xec   :  { %v231_v10 = vsel %vm221_vm8, nan, %v230_v29  ;;  %v540_v17 = vsel %vm221_vm8, nan, %v539_v2 }
  0xed   :  { %v366_v55 = vadd.f32 1.0, %v365_v20  ;;  %v373_v56 = vadd.f32 1.0, %v372_v52 }
  0xef   :  { %v374_v59 = vmul.f32 %v373_v56, %v358_v26  ;;  %v382_v51 = vxor.u32 2147483648, %v366_v55  ;;  %982 = vmatpush.bf16.msra.mxu2 %v1148_v34 }
  0xf1   :  { %v379_v61 = vxor.u32 2147483648, %v374_v59  ;;  %v383_v63 = vsel %vm381_vm3, %v382_v51, %v374_v59  ;;  %v693_v7 = vsel %vm691_vm7, %v382_v51, %v374_v59 }
  0xf3   :  { %v380_v1 = vsel %vm378_vm2, %v366_v55, %v379_v61  ;;  %v690_v3 = vsel %vm688_vm6, %v366_v55, %v379_v61  ;;  %983 = vmatpush.bf16.msra.mxu2 %v1147_v37 }
  0xf4   :  { %v384_v8 = vsel %vm377_vm1, %v380_v1, %v383_v63  ;;  %v694_v9 = vsel %vm687_vm5, %v690_v3, %v693_v7 }
  0xf5   :  { %v385_v15 = vsel %vm375_vm9, nan, %v384_v8  ;;  %v695_v21 = vsel %vm375_vm9, nan, %v694_v9 }
  0xf6   :  { %v696_v6 = vpack.c.bf16 %v385_v15, %v231_v10  ;;  %v697_v47 = vpack.c.bf16 %v695_v21, %v540_v17 }
  0xf7   :  { %984 = vmatpush.bf16.msra.mxu2 %v1146_v19 }
  0xf8   :  { %838 = vmatmul.bf16.vlgmr.msra.gmra.mxu0 %v696_v6  ;;  %852 = vmatmul.bf16.vlgmr.msra.gmra.mxu1 %v697_v47 }
  0xfb   :  { %985 = vmatpush.bf16.msra.mxu2 %v1145_v14 }
 0x175   :  { %v839_v22 = vpop.f32.mrf.mxu0  ;;  %v853_v18 = vpop.f32.mrf.mxu1 }
 0x176   :  { %v840_v24 = vadd.f32 %v1174_v5, %v839_v22 }
 0x178   :  { %v854_v25 = vadd.f32 %v853_v18, %v840_v24 }
 0x17a   :  { %v1090_v28 = vmul.f32 -1.442695, %v854_v25 }
 0x17c   :  { %1176 = vpow2.f32 %v1090_v28 }
 0x17d   :  { %v841_v46 = vpop.f32.mrf.mxu0  ;;  %v855_v35 = vpop.f32.mrf.mxu1 }
 0x17e   :  { %v842_v26 = vadd.f32 %v1174_v5, %v841_v46 }
 0x180   :  { %v856_v33 = vadd.f32 %v855_v35, %v842_v26 }
 0x182   :  { %v1177_v16 = vpop.eup %1176  ;;  %v1091_v4 = vmul.f32 -1.442695, %v856_v33 }
 0x183   :  { %v864_v38 = vadd.f32 1.0, %v1177_v16 }
 0x184   :  { %1178 = vpow2.f32 %v1091_v4 }
 0x185   :  { %1180 = vrcp.f32 %v864_v38  ;;  %v877_v45 = vand.u32 2147483648, %v864_v38  ;;  %vm871_vm11 = vweird.f32 %v864_v38  ;;  %v875_v36 = vand.u32 2147483647, %v864_v38 }
 0x187   :  { %v878_v52 = vor.u32 1.1754944e-38, %v877_v45  ;;  %vm876_vm14 = vcmp.eq.f32.partialorder %v875_v36, 8.507059e+37 }
 0x18a   :  { %v1179_v32 = vpop.eup %1178 }
 0x18b   :  { %v1181_v31 = vpop.eup %1180  ;;  %v865_v40 = vadd.f32 1.0, %v1179_v32 }
 0x18c   :  { %v867_v12 = vmul.f32 %v1181_v31, %v864_v38  ;;  %vm872_vm10 = vweird.f32 %v1181_v31 }
 0x18d   :  { %1182 = vrcp.f32 %v865_v40  ;;  %vm873_vm12 = vmor %vm871_vm11, %vm872_vm10  ;;  %v892_v39 = vand.u32 2147483648, %v865_v40  ;;  %v890_v20 = vand.u32 2147483647, %v865_v40  ;;  %vm886_vm15 = vweird.f32 %v865_v40 }
 0x18e   :  { %v868_v41 = vsub.f32 1.0, %v867_v12 }
 0x18f   :  { %v893_v55 = vor.u32 1.1754944e-38, %v892_v39  ;;  %vm891_vm1 = vcmp.eq.f32.partialorder %v890_v20, 8.507059e+37 }
 0x190   :  { %v869_v43 = vmul.f32 %v1181_v31, %v868_v41 }
 0x192   :  { %v870_v44 = vadd.f32 %v1181_v31, %v869_v43 }
 0x193   :  { %v1183_v11 = vpop.eup %1182 }
 0x194   :  { %v882_v27 = vmul.f32 %v1183_v11, %v865_v40  ;;  %v874_v50 = vsel %vm873_vm12, %v1181_v31, %v870_v44  ;;  %vm887_vm13 = vweird.f32 %v1183_v11 }
 0x195   :  { %v879_v54 = vsel %vm876_vm14, %v878_v52, %v874_v50  ;;  %vm888_vm0 = vmor %vm886_vm15, %vm887_vm13 }
 0x196   :  { %v883_v49 = vsub.f32 1.0, %v882_v27  ;;  %v896_v58 = vmul.f32 %v879_v54, %v854_v25 }
 0x198   :  { %v884_v48 = vmul.f32 %v1183_v11, %v883_v49 }
 0x19a   :  { %v885_v53 = vadd.f32 %v1183_v11, %v884_v48 }
 0x19c   :  { %v889_v56 = vsel %vm888_vm0, %v1183_v11, %v885_v53 }
 0x19d   :  { %v894_v42 = vsel %vm891_vm1, %v893_v55, %v889_v56 }
 0x19e   :  { %v897_v59 = vmul.f32 %v894_v42, %v856_v33 }
 0x1a0   :  { %v1156_v51 = vpack.c.bf16 %v897_v59, %v896_v58 }
 0x1a2   :  { %1157 = vst [vmem:[#allocation2] sm:$0xff] %v1156_v51  }
 0x1a9   :  { %v1144_v57 = vld [vmem:[#allocation2] sm:$0xff] }
 0x1aa   :  { %986 = vmatmul.bf16.vlgmr.msra.gmra.mxu2 %v1144_v57 }
 0x22d   :  { %v987_v61 = vpop.f32.mrf.mxu2 }
 0x22e   :  { %v988_v62 = vadd.f32 %v1175_v60, %v987_v61 }
 0x230   :  { %992 = vst [vmem:[#allocation8] sm:$0xff] %v988_v62 }
 0x235   :  { %v989_v29 = vpop.f32.mrf.mxu2 }
 0x236   :  { %v990_v2 = vadd.f32 %v1175_v60, %v989_v29 }
 0x238   :  { %993 = vst [vmem:[#allocation8 + $0x8] sm:$0xff] %v990_v2 }
 0x239   :  { %1006 = dma.vmem_to_hbm [thread:$0]  %s999_s15, 256, %s1001_s18, [#allocation5], %s1274_s19, %s1274_s19, %s1275_s20  }
 0x23a   :  { %1260 = dma.done.wait [#allocation5], 256  }
 0x23b   :  { %1261 = vsyncadd [#allocation5], 4294967040 }
 0x23c   :  { %1011 = vsyncpa [#allocation4], 1 }
 0x23d   :  { %1012 = vsyncpa [#allocation7], 1 }
 0x23e   :  { %1013 = vsyncpa [#allocation5], 1 }

</bundles_post_ra>
